<compile_context>
chip_gen: v7x
topology: tpu7x:2x2x1
jax: 0.10.0
libtpu: 0.0.40
codegen_flags: <defaults>
</compile_context>

<pallas_src>
import functools

import jax
import jax.numpy as jnp
from jax import lax
from jax.experimental import pallas as pl
from jax.experimental.pallas import tpu as pltpu

BN_EPS = 1e-5


def _round_up(x, m):
    return ((x + m - 1) // m) * m


def _pad_to(a, shape):
    pads = [(0, t - s) for s, t in zip(a.shape, shape)]
    return jnp.pad(a, pads)


def _layer_kernel(alpha_ref, x_ref, w_ref, gb_ref, o_ref):
    """One output-feature tile of Linear -> BN(train) -> PReLU.

    alpha_ref : SMEM (1,)  f32      PReLU alpha for this layer
    x_ref     : VMEM (N, K_pad)     full-batch input (bf16 or f32)
    w_ref     : VMEM (K_pad, TN)    weight tile (bf16 or f32)
    gb_ref    : VMEM (2, TN)  f32   row 0 = gamma, row 1 = beta
    o_ref     : VMEM (N, TN)        output tile
    """
    # MXU matmul, f32 accumulation.
    h = jnp.dot(x_ref[...], w_ref[...], preferred_element_type=jnp.float32)

    # One-pass batch statistics (per feature, over the full batch).
    n = h.shape[0]
    inv_n = 1.0 / float(n)
    s = jnp.sum(h, axis=0, keepdims=True)
    ss = jnp.sum(h * h, axis=0, keepdims=True)
    mean = s * inv_n
    var = jnp.maximum(ss * inv_n - mean * mean, 0.0)  # biased variance

    # Fold BN into one scale/shift per feature (rsqrt -> EUP slot).
    gamma = gb_ref[0:1, :]
    beta = gb_ref[1:2, :]
    scale = gamma * lax.rsqrt(var + BN_EPS)
    shift = beta - mean * scale
    hn = h * scale + shift

    # PReLU with a single shared alpha.
    alpha = alpha_ref[0]
    o_ref[...] = jnp.where(hn > 0, hn, alpha * hn).astype(o_ref.dtype)


def _linear_bn_prelu(x_p, w_p, gb, alpha, out_dtype):
    """x_p: (N, K_pad), w_p: (K_pad, P_pad), gb: (2, P_pad), alpha: (1,)."""
    n, k_pad = x_p.shape
    p_pad = w_p.shape[1]
    tn = 256 if p_pad % 256 == 0 else 128
    grid = (p_pad // tn,)

    out_itemsize = jnp.dtype(out_dtype).itemsize
    bytes_accessed = int(
        x_p.size * x_p.dtype.itemsize
        + w_p.size * w_p.dtype.itemsize
        + gb.size * 4
        + 4
        + n * p_pad * out_itemsize
    )
    cost = pl.CostEstimate(
        flops=int(2 * n * k_pad * p_pad + 10 * n * p_pad),
        transcendentals=int(p_pad),
        bytes_accessed=bytes_accessed,
    )

    return pl.pallas_call(
        _layer_kernel,
        out_shape=jax.ShapeDtypeStruct((n, p_pad), out_dtype),
        grid_spec=pltpu.PrefetchScalarGridSpec(
            num_scalar_prefetch=0,
            grid=grid,
            in_specs=[
                pl.BlockSpec(memory_space=pltpu.MemorySpace.SMEM),   # alpha
                pl.BlockSpec((n, k_pad), lambda j: (0, 0)),          # x (resident)
                pl.BlockSpec((k_pad, tn), lambda j: (0, j)),         # weight tile
                pl.BlockSpec((2, tn), lambda j: (0, j)),             # gamma/beta tile
            ],
            out_specs=pl.BlockSpec((n, tn), lambda j: (0, j)),
        ),
        compiler_params=pltpu.CompilerParams(
            dimension_semantics=("parallel",),
            vmem_limit_bytes=48 * 1024 * 1024,
        ),
        cost_estimate=cost,
    )(alpha, x_p, w_p, gb)


def default_conditional_forward(x, params, *, matmul_dtype=jnp.bfloat16):
    """x: [N, in_features] float32.  params: dict from init_params."""
    n, k = x.shape
    p = params["w1"].shape[1]

    k_pad = _round_up(k, 128)
    p_pad = _round_up(p, 128)

    # Lane-dense padding (feature axes only; batch stays whole for BN stats).
    x_p = _pad_to(x, (n, k_pad)).astype(matmul_dtype)
    w1 = _pad_to(params["w1"], (k_pad, p_pad)).astype(matmul_dtype)
    w2 = _pad_to(params["w2"], (p_pad, p_pad)).astype(matmul_dtype)
    w3 = _pad_to(params["w3"], (p_pad, p_pad)).astype(matmul_dtype)

    def gb_slab(g, b):
        return _pad_to(jnp.concatenate([g, b], axis=0), (2, p_pad)).astype(jnp.float32)

    gb1 = gb_slab(params["g1"], params["b1"])
    gb2 = gb_slab(params["g2"], params["b2"])
    gb3 = gb_slab(params["g3"], params["b3"])

    alphas = params["alphas"].astype(jnp.float32)

    # Intermediate activations stay in matmul_dtype so the next MXU pass is fed
    # directly; BN/PReLU math inside the kernel is always f32.
    h = _linear_bn_prelu(x_p, w1, gb1, alphas[0:1], matmul_dtype)
    h = _linear_bn_prelu(h, w2, gb2, alphas[1:2], matmul_dtype)
    h = _linear_bn_prelu(h, w3, gb3, alphas[2:3], jnp.float32)
    return h[:, :p]


def init_params(key, in_features, n_params):
    """Deterministic init matching the module's parameter shapes.

    nn.Linear weight is (out, in); we store it pre-transposed as (in, out) and
    use PyTorch's default uniform(-1/sqrt(fan_in), 1/sqrt(fan_in)) range.
    BatchNorm1d: gamma=1, beta=0.  PReLU: alpha=0.25.
    """
    k1, k2, k3 = jax.random.split(key, 3)

    def lin(k, fan_in, fan_out):
        bound = 1.0 / jnp.sqrt(jnp.float32(fan_in))
        w = jax.random.uniform(k, (fan_out, fan_in), jnp.float32, -bound, bound)
        return w.T  # pre-transpose to (in, out) for the kernel

    ones = jnp.ones((1, n_params), jnp.float32)
    zeros = jnp.zeros((1, n_params), jnp.float32)
    return {
        "w1": lin(k1, in_features, n_params),
        "g1": ones, "b1": zeros,
        "w2": lin(k2, n_params, n_params),
        "g2": ones, "b2": zeros,
        "w3": lin(k3, n_params, n_params),
        "g3": ones, "b3": zeros,
        "alphas": jnp.full((3,), 0.25, jnp.float32),
    }


def reference_forward(x, params, *, matmul_dtype=jnp.float32):
    """Pure-JAX reference of the PyTorch forward (training-mode BN).

    With matmul_dtype=float32 this is the exact module semantics; with bf16 it
    mirrors the kernel's mixed-precision MXU feeds (f32 accumulation).
    """
    def bn_prelu(h, g, b, a):
        m = jnp.mean(h, axis=0, keepdims=True)
        v = jnp.mean((h - m) ** 2, axis=0, keepdims=True)
        hn = (h - m) / jnp.sqrt(v + BN_EPS) * g + b
        return jnp.where(hn > 0, hn, a * hn)

    h = x
    for l in range(3):
        w = params[f"w{l + 1}"].astype(matmul_dtype)
        h = jnp.dot(h.astype(matmul_dtype), w, preferred_element_type=jnp.float32)
        h = bn_prelu(h, params[f"g{l + 1}"], params[f"b{l + 1}"], params["alphas"][l])
    return h


if __name__ == "__main__":
    batch = 8
    in_features = 16
    n_params = 32

    key = jax.random.PRNGKey(0)
    kx, kp = jax.random.split(key)
    x = jax.random.normal(kx, (batch, in_features), jnp.float32)
    params = init_params(kp, in_features, n_params)

    # 1) Strict check of the module semantics with f32 MXU feeds.
    out_f32 = jax.block_until_ready(
        default_conditional_forward(x, params, matmul_dtype=jnp.float32))
    ref_f32 = reference_forward(x, params, matmul_dtype=jnp.float32)
    assert out_f32.shape == (batch, n_params)
    assert jnp.allclose(out_f32, ref_f32, atol=1e-4, rtol=1e-4), "f32 mismatch vs reference"

    # 2) Optimized path: bf16 MXU feeds, f32 accumulation / BN / PReLU.
    out_bf16 = jax.block_until_ready(
        default_conditional_forward(x, params, matmul_dtype=jnp.bfloat16))
    ref_bf16 = reference_forward(x, params, matmul_dtype=jnp.bfloat16)
    assert out_bf16.shape == (batch, n_params)
    assert jnp.allclose(out_bf16, ref_bf16, atol=5e-2, rtol=5e-2), "bf16 mismatch vs reference"

    print("KERNEL_OK")
</pallas_src>

<mosaic_0001>
module attributes {stable_mosaic.version = 11 : i64} {
  func.func @_layer_kernel(%arg0: i32, %arg1: memref<1xf32, #tpu.memory_space<smem>>, %arg2: memref<8x128xf32, #tpu.memory_space<vmem>>, %arg3: memref<128x128xf32, #tpu.memory_space<vmem>>, %arg4: memref<2x128xf32, #tpu.memory_space<vmem>>, %arg5: memref<8x128xf32, #tpu.memory_space<vmem>>) attributes {dimension_semantics = [#tpu.dimension_semantics<parallel>], iteration_bounds = array<i64: 1>, scalar_prefetch = 0 : i64, scratch_operands = 0 : i64, tpu.core_type = #tpu.core_type<tc>, window_params = [{transform_indices = @transform_0, window_bounds = array<i64: 1>}, {pipeline_mode = #tpu.pipeline_mode<synchronous>, transform_indices = @transform_1, window_bounds = array<i64: 8, 128>}, {transform_indices = @transform_2, window_bounds = array<i64: 128, 128>}, {transform_indices = @transform_3, window_bounds = array<i64: 2, 128>}, {transform_indices = @transform_4, window_bounds = array<i64: 8, 128>}]} {
    %c0 = arith.constant 0 : index
    %c0_0 = arith.constant 0 : index
    %0 = vector.load %arg2[%c0, %c0_0] : memref<8x128xf32, #tpu.memory_space<vmem>>, vector<8x128xf32>
    %c0_1 = arith.constant 0 : index
    %c0_2 = arith.constant 0 : index
    %1 = vector.load %arg3[%c0_1, %c0_2] : memref<128x128xf32, #tpu.memory_space<vmem>>, vector<128x128xf32>
    %cst = arith.constant dense<0.000000e+00> : vector<8x128xf32>
    %2 = tpu.matmul %0, %1, %cst {dimension_numbers = #tpu.dot_dimension_numbers<[1], [0], [0], [1], [0, 0, 1, 1], [], []>} : vector<8x128xf32>, vector<128x128xf32>, vector<8x128xf32> -> vector<8x128xf32>
    %cst_3 = arith.constant dense<0.000000e+00> : vector<128xf32>
    %3 = vector.multi_reduction <add>, %2, %cst_3 [0] : vector<8x128xf32> to vector<128xf32>
    %4 = vector.shape_cast %3 : vector<128xf32> to vector<1x128xf32>
    %5 = arith.mulf %2, %2 : vector<8x128xf32>
    %cst_4 = arith.constant dense<0.000000e+00> : vector<128xf32>
    %6 = vector.multi_reduction <add>, %5, %cst_4 [0] : vector<8x128xf32> to vector<128xf32>
    %7 = vector.shape_cast %6 : vector<128xf32> to vector<1x128xf32>
    %cst_5 = arith.constant 1.250000e-01 : f32
    %8 = vector.broadcast %cst_5 : f32 to vector<1x128xf32>
    %9 = arith.mulf %4, %8 : vector<1x128xf32>
    %cst_6 = arith.constant 1.250000e-01 : f32
    %10 = vector.broadcast %cst_6 : f32 to vector<1x128xf32>
    %11 = arith.mulf %7, %10 : vector<1x128xf32>
    %12 = arith.mulf %9, %9 : vector<1x128xf32>
    %13 = arith.subf %11, %12 : vector<1x128xf32>
    %cst_7 = arith.constant 0.000000e+00 : f32
    %14 = vector.broadcast %cst_7 : f32 to vector<1x128xf32>
    %15 = arith.maximumf %13, %14 : vector<1x128xf32>
    %c0_8 = arith.constant 0 : index
    %c0_9 = arith.constant 0 : index
    %16 = vector.load %arg4[%c0_8, %c0_9] : memref<2x128xf32, #tpu.memory_space<vmem>>, vector<1x128xf32>
    %c1 = arith.constant 1 : index
    %c0_10 = arith.constant 0 : index
    %17 = vector.load %arg4[%c1, %c0_10] : memref<2x128xf32, #tpu.memory_space<vmem>>, vector<1x128xf32>
    %cst_11 = arith.constant 9.99999974E-6 : f32
    %18 = vector.broadcast %cst_11 : f32 to vector<1x128xf32>
    %19 = arith.addf %15, %18 : vector<1x128xf32>
    %20 = math.rsqrt %19 : vector<1x128xf32>
    %21 = arith.mulf %16, %20 : vector<1x128xf32>
    %22 = arith.mulf %9, %21 : vector<1x128xf32>
    %23 = arith.subf %17, %22 : vector<1x128xf32>
    %24 = vector.broadcast %21 : vector<1x128xf32> to vector<8x128xf32>
    %25 = arith.mulf %2, %24 : vector<8x128xf32>
    %26 = vector.broadcast %23 : vector<1x128xf32> to vector<8x128xf32>
    %27 = arith.addf %25, %26 : vector<8x128xf32>
    %c0_12 = arith.constant 0 : index
    %28 = memref.load %arg1[%c0_12] : memref<1xf32, #tpu.memory_space<smem>>
    %cst_13 = arith.constant 0.000000e+00 : f32
    %29 = vector.broadcast %cst_13 : f32 to vector<8x128xf32>
    %30 = arith.cmpf ogt, %27, %29 : vector<8x128xf32>
    %31 = vector.broadcast %28 : f32 to vector<8x128xf32>
    %32 = arith.mulf %31, %27 : vector<8x128xf32>
    %33 = arith.select %30, %27, %32 : vector<8x128xi1>, vector<8x128xf32>
    %c0_14 = arith.constant 0 : index
    %c0_15 = arith.constant 0 : index
    %34 = vector.load %arg5[%c0_14, %c0_15] : memref<8x128xf32, #tpu.memory_space<vmem>>, vector<8x128xf32>
    tpu.vector_store %arg5[%c0_14, %c0_15], %33 {strides = array<i32>} : memref<8x128xf32, #tpu.memory_space<vmem>>, vector<8x128xf32>,
    return
  }
  func.func @transform_0(%arg0: i32) -> i32 {
    %c0_i32 = arith.constant 0 : i32
    %c0_i32_0 = arith.constant 0 : i32
    return %c0_i32 : i32
  }
  func.func @transform_1(%arg0: i32) -> (i32, i32) {
    %c0_i32 = arith.constant 0 : i32
    %c0_i32_0 = arith.constant 0 : i32
    %c0_i32_1 = arith.constant 0 : i32
    return %c0_i32, %c0_i32_0 : i32, i32
  }
  func.func @transform_2(%arg0: i32) -> (i32, i32) {
    %c0_i32 = arith.constant 0 : i32
    %c0_i32_0 = arith.constant 0 : i32
    return %c0_i32, %arg0 : i32, i32
  }
  func.func @transform_3(%arg0: i32) -> (i32, i32) {
    %c0_i32 = arith.constant 0 : i32
    %c0_i32_0 = arith.constant 0 : i32
    return %c0_i32, %arg0 : i32, i32
  }
  func.func @transform_4(%arg0: i32) -> (i32, i32) {
    %c0_i32 = arith.constant 0 : i32
    %c0_i32_0 = arith.constant 0 : i32
    return %c0_i32, %arg0 : i32, i32
  }
}

</mosaic_0001>

<bundles_post_ra>
// kernel: tpu_custom_call.1
= control target key start
LH: loop header
LB: loop body
LE: loop exit
PB: predicated region body
PF: predicated region fallthrough
CT: control target
= control target key end

     0   :  { %10 = vsyncpa [#allocation4], 0  ;;  %s432_s0 = inlined_call_operand.<no memory space> [shape: f32[1], index: 0, kind: input, shape index: {}]   ;;  %s433_s1 = inlined_call_operand.hbm [shape: f32[8,128], index: 1, kind: input, shape index: {}]   ;;  %s434_s2 = inlined_call_operand.hbm [shape: f32[128,128], index: 2, kind: input, shape index: {}]   ;;  %s435_s3 = inlined_call_operand.vmem [shape: f32[2,128], index: 3, kind: input, shape index: {}]   ;;  %s436_s4 = inlined_call_operand.hbm [shape: f32[8,128], index: 4, kind: output, shape index: {}]  }
   0x1   :  { %11 = vsyncpa [#allocation7], 0 }
   0x2   :  { %12 = vsyncpa [#allocation5], 0  ;;  %s347_s15 = smov [#allocation3]   ;;  %s348_s17 = smov [#allocation6]  }
   0x3   :  { %s21_s16 = sshll.u32 %s347_s15, 4  ;;  %s30_s18 = sshll.u32 %s348_s17, 4  ;;  %s22_s16 = int_to_ptr.vmem [resolvable:$true] %s21_s16  ;;  %s380_s18 = int_to_ptr.vmem [resolvable:$true] %s30_s18 }
   0x4   :  { %s275_s21 = scalar_lea.hbm %s433_s1, 128 }
   0x5   :  { %p276_p0 = scmp.ne.s32.totalorder %s433_s1, %s275_s21  ;;  %p279_p1 = scmp.lt.u32.totalorder %s275_s21, %s433_s1 }
   0x7   :  { %p281_p2 = pnand %p279_p1, %p276_p0 }
   0x9   :  { %284 = shalt.err (!%p281_p2)
}
   0xa   :  { %s285_s26 = scalar_lea.vmem %s22_s16, 128  ;;  %p290_p4 = scmp.lt.s32.totalorder %s22_s16, %s22_s16 }
   0xb   :  { %p286_p3 = scmp.ne.s32.totalorder %s22_s16, %s285_s26  ;;  %p291_p5 = scmp.lt.s32.totalorder %s285_s26, %s285_s26 }
   0xd   :  { %p292_p6 = por %p291_p5, %p290_p4 }
   0xf   :  { %p293_p7 = pnand %p292_p6, %p286_p3 }
  0x11   :  { %296 = shalt.err (!%p293_p7)
}
  0x12   :  { %24 = dma.hbm_to_vmem [thread:$0]  %s433_s1, 128, %s22_s16, [#allocation4]  }
  0x13   :  { %s297_s5 = scalar_lea.hbm %s434_s2, 2048 }
  0x14   :  { %p298_p8 = scmp.ne.s32.totalorder %s434_s2, %s297_s5  ;;  %p301_p9 = scmp.lt.u32.totalorder %s297_s5, %s434_s2 }
  0x16   :  { %p303_p10 = pnand %p301_p9, %p298_p8 }
  0x18   :  { %306 = shalt.err (!%p303_p10)
}
  0x19   :  { %s307_s10 = scalar_lea.vmem %s380_s18, 2048  ;;  %p312_p12 = scmp.lt.s32.totalorder %s380_s18, %s380_s18 }
  0x1a   :  { %p308_p11 = scmp.ne.s32.totalorder %s380_s18, %s307_s10  ;;  %p313_p13 = scmp.lt.s32.totalorder %s307_s10, %s307_s10 }
  0x1c   :  { %p314_p0 = por %p313_p13, %p312_p12 }
  0x1e   :  { %p315_p1 = pnand %p314_p0, %p308_p11 }
  0x20   :  { %318 = shalt.err (!%p315_p1)
}
  0x21   :  { %s349_s1 = smov 128   ;;  %s350_s11 = smov 8  }
  0x22   :  { %36 = dma.hbm_to_vmem [thread:$0]  %s434_s2, 2048, %s380_s18, [#allocation7], %s349_s1, %s349_s1, %s350_s11  }
  0x23   :  { %341 = dma.done.wait [#allocation4], 128  }
  0x24   :  { %342 = vsyncadd [#allocation4], 4294967168 }
  0x25   :  { %343 = dma.done.wait [#allocation7], 2048  }
  0x26   :  { %344 = vsyncadd [#allocation7], 4294965248  ;;  %v351_v0 = vmov 0.0|0.0   ;;  %vm352_vm0 = vmmov 0   ;;  %v353_v1 = vmov 0.0   ;;  %v46_v2 = vld [vmem:[#allocation6] sm:$0xff]  ;;  %v157_v48 = vlaneseq }
  0x27   :  { %241 = vmatprep.subr.bf16.mxu0 %v351_v0  ;;  %238 = vmatprep.mubr.msk.f32.mxu0 %vm352_vm0, %v353_v1  ;;  %v47_v3 = vld [vmem:[#allocation6 + $0x8] sm:$0xff]  ;;  %v48_v4 = vld [vmem:[#allocation6 + $0x10] sm:$0xff]  ;;  %v49_v6 = vld [vmem:[#allocation6 + $0x18] sm:$0xff]  ;;  %v169_v60 = vstv %s432_s0  ;;  %s354_s19 = smov [#allocation8]  }
  0x28   :  { %v242_v5 = vpack.c.bf16 %v47_v3, %v46_v2  ;;  %v245_v7 = vpack.c.bf16 %v49_v6, %v48_v4  ;;  %v50_v8 = vld [vmem:[#allocation6 + $0x20] sm:$0xff]  ;;  %v51_v9 = vld [vmem:[#allocation6 + $0x28] sm:$0xff]  ;;  %v52_v11 = vld [vmem:[#allocation6 + $0x30] sm:$0xff]  ;;  %v158_v49 = vshrl.u32 %v157_v48, 7  ;;  %s179_s20 = sshll.u32 %s354_s19, 4  ;;  %s180_s20 = int_to_ptr.vmem [resolvable:$true] %s179_s20 }
  0x29   :  { %v248_v10 = vpack.c.bf16 %v51_v9, %v50_v8  ;;  %v53_v12 = vld [vmem:[#allocation6 + $0x38] sm:$0xff]  ;;  %v54_v14 = vld [vmem:[#allocation6 + $0x40] sm:$0xff]  ;;  %v55_v15 = vld [vmem:[#allocation6 + $0x48] sm:$0xff]  ;;  %s319_s21 = scalar_lea.vmem %s180_s20, 128  ;;  %p324_p3 = scmp.lt.s32.totalorder %s180_s20, %s180_s20 }
  0x2a   :  { %243 = vmatpush3.bf16.msra.mxu0 %v242_v5  ;;  %v251_v13 = vpack.c.bf16 %v53_v12, %v52_v11  ;;  %v254_v16 = vpack.c.bf16 %v55_v15, %v54_v14  ;;  %v56_v17 = vld [vmem:[#allocation6 + $0x50] sm:$0xff]  ;;  %v57_v18 = vld [vmem:[#allocation6 + $0x58] sm:$0xff]  ;;  %v58_v20 = vld [vmem:[#allocation6 + $0x60] sm:$0xff]  ;;  %v159_v51 = vsub.s32 0, %v158_v49  ;;  %p320_p2 = scmp.ne.s32.totalorder %s180_s20, %s319_s21  ;;  %p325_p4 = scmp.lt.s32.totalorder %s319_s21, %s319_s21 }
  0x2b   :  { %244 = vmatprep.subr.bf16.mxu0 %v351_v0  ;;  %v257_v19 = vpack.c.bf16 %v57_v18, %v56_v17  ;;  %v59_v21 = vld [vmem:[#allocation6 + $0x68] sm:$0xff]  ;;  %v60_v23 = vld [vmem:[#allocation6 + $0x70] sm:$0xff]  ;;  %v61_v24 = vld [vmem:[#allocation6 + $0x78] sm:$0xff] }
  0x2c   :  { %v260_v22 = vpack.c.bf16 %v59_v21, %v58_v20  ;;  %v263_v25 = vpack.c.bf16 %v61_v24, %v60_v23  ;;  %v45_v26 = vld [vmem:[#allocation3] sm:$0xff]  ;;  %p326_p5 = por %p325_p4, %p324_p3 }
  0x2d   :  { %v150_v50 = vld [vmem:[%s435_s3] sm:$0x1]  ;;  %v151_v54 = vld [vmem:[%s435_s3 + $0x1] sm:$0x1] }
  0x2e   :  { %246 = vmatpush3.bf16.msra.mxu0 %v245_v7  ;;  %p327_p6 = pnand %p326_p5, %p320_p2 }
  0x2f   :  { %247 = vmatprep.subr.bf16.mxu0 %v351_v0 }
  0x32   :  { %249 = vmatpush3.bf16.msra.mxu0 %v248_v10 }
  0x33   :  { %250 = vmatprep.subr.bf16.mxu0 %v351_v0 }
  0x36   :  { %252 = vmatpush3.bf16.msra.mxu0 %v251_v13 }
  0x37   :  { %253 = vmatprep.subr.bf16.mxu0 %v351_v0 }
  0x3a   :  { %255 = vmatpush3.bf16.msra.mxu0 %v254_v16 }
  0x3b   :  { %256 = vmatprep.subr.bf16.mxu0 %v351_v0 }
  0x3e   :  { %258 = vmatpush3.bf16.msra.mxu0 %v257_v19 }
  0x3f   :  { %259 = vmatprep.subr.bf16.mxu0 %v351_v0 }
  0x42   :  { %261 = vmatpush3.bf16.msra.mxu0 %v260_v22 }
  0x43   :  { %262 = vmatprep.subr.bf16.mxu0 %v351_v0 }
  0x46   :  { %264 = vmatpush3.bf16.msra.mxu0 %v263_v25 }
  0x49   :  { %239 = vmatmul.mubr.f32.vlgmr.msra.gmra.mrb[0].mxu0 %v45_v26 }
 0x11c   :  { %v128_v27 = vpop.f32.mrb[0].mxu0 }
 0x11d   :  { %v132_v28 = vrot.slane %v128_v27, 4  ;;  %v138_v29 = vmul.f32 %v128_v27, %v128_v27  ;;  %v240_v30 = vpop.f32.mrb[1].mxu0 }
 0x11f   :  { %v133_v31 = vadd.f32 %v132_v28, %v128_v27  ;;  %v139_v32 = vrot.slane %v138_v29, 4 }
 0x121   :  { %v134_v33 = vrot.slane %v133_v31, 2  ;;  %v140_v34 = vadd.f32 %v139_v32, %v138_v29 }
 0x123   :  { %v135_v35 = vadd.f32 %v134_v33, %v133_v31  ;;  %v141_v36 = vrot.slane %v140_v34, 2 }
 0x125   :  { %v136_v37 = vrot.slane %v135_v35, 1  ;;  %v142_v38 = vadd.f32 %v141_v36, %v140_v34 }
 0x127   :  { %v137_v39 = vadd.f32 %v136_v37, %v135_v35  ;;  %v143_v40 = vrot.slane %v142_v38, 1 }
 0x129   :  { %v144_v41 = vadd.f32 %v143_v40, %v142_v38  ;;  %v145_v42 = vmul.f32 0.125, %v137_v39 }
 0x12b   :  { %v146_v43 = vmul.f32 0.125, %v144_v41  ;;  %v147_v44 = vmul.f32 %v145_v42, %v145_v42 }
 0x12d   :  { %v148_v45 = vsub.f32 %v146_v43, %v147_v44 }
 0x12f   :  { %v149_v46 = vmax.f32 %v148_v45, 0.0 }
 0x131   :  { %v152_v47 = vadd.f32 1e-05, %v149_v46 }
 0x133   :  { %273 = vrsqrt.f32 %v152_v47 }
 0x13d   :  { %v274_v52 = vpop.eup %273 }
 0x13e   :  { %v154_v53 = vmul.f32 %v274_v52, %v150_v50 }
 0x140   :  { %v155_v55 = vmul.f32 %v154_v53, %v145_v42  ;;  %v160_v56 = vrot.slane %v154_v53, %v159_v51 }
 0x142   :  { %v156_v57 = vsub.f32 %v151_v54, %v155_v55  ;;  %v161_v58 = vmul.f32 %v160_v56, %v128_v27 }
 0x144   :  { %v165_v59 = vrot.slane %v156_v57, %v159_v51 }
 0x146   :  { %v166_v61 = vadd.f32 %v165_v59, %v161_v58 }
 0x148   :  { %vm168_vm1 = vcmp.gt.f32.partialorder %v166_v61, 0.0  ;;  %v170_v62 = vmul.f32 %v169_v60, %v166_v61 }
 0x14a   :  { %v171_v63 = vsel %vm168_vm1, %v166_v61, %v170_v62 }
 0x14b   :  { %172 = vst [vmem:[#allocation8] sm:$0xff] %v171_v63 }
 0x14c   :  { %330 = shalt.err (!%p327_p6)
}
 0x14d   :  { %s331_s23 = scalar_lea.hbm %s436_s4, 128 }
 0x14e   :  { %p332_p7 = scmp.ne.s32.totalorder %s436_s4, %s331_s23  ;;  %p335_p8 = scmp.lt.u32.totalorder %s331_s23, %s436_s4 }
 0x150   :  { %p337_p9 = pnand %p335_p8, %p332_p7 }
 0x152   :  { %340 = shalt.err (!%p337_p9)
}
 0x153   :  { %182 = dma.vmem_to_hbm [thread:$0]  %s180_s20, 128, %s436_s4, [#allocation5]  }
 0x154   :  { %345 = dma.done.wait [#allocation5], 128  }
 0x155   :  { %346 = vsyncadd [#allocation5], 4294967168 }
 0x156   :  { %186 = vsyncpa [#allocation4], 1 }
 0x157   :  { %187 = vsyncpa [#allocation7], 1 }
 0x158   :  { %188 = vsyncpa [#allocation5], 1 }

</bundles_post_ra>
